<compile_context>
chip_gen: v7x
topology: tpu7x:2x2x1
jax: 0.10.0
libtpu: 0.0.40
codegen_flags: <defaults>
</compile_context>

<pallas_src>
import jax
import jax.numpy as jnp
from jax.experimental import pallas as pl
from jax.experimental.pallas import tpu as pltpu


def _round_up(x, m):
    return ((x + m - 1) // m) * m


def mlp_kernel(x_ref, w1t_ref, b1_ref, w2t_ref, b2_ref, o_ref):
    # Cast in-kernel (instead of a separate XLA pass over x in HBM).
    x = x_ref[...].astype(w1t_ref.dtype)
    # hidden = relu(x @ W1t + b1), accumulated in f32 on the MXU.
    h = jnp.dot(x, w1t_ref[...], preferred_element_type=jnp.float32)
    h = jnp.maximum(h + b1_ref[...], 0.0)            # bias + ReLU in f32 (VPU)
    # Second MXU pass: operands in compute dtype (bf16 by default), f32 acc.
    h = h.astype(w2t_ref.dtype)
    y = jnp.dot(h, w2t_ref[...], preferred_element_type=jnp.float32)
    # Output block is only (bm, n_output): tiny writeback, no padded lanes.
    o_ref[...] = (y + b2_ref[...]).astype(o_ref.dtype)


def prepare_params(w1, b1, w2, b2, *, compute_dtype=jnp.bfloat16):
    """One-time parameter prep (hoisted out of the per-call path).

    w1: (n_hidden, n_feature), b1: (n_hidden,), w2: (n_output, n_hidden),
    b2: (n_output,)  --  PyTorch nn.Linear layout.

    The hidden (contraction) axis is zero-padded to 128 lanes so the
    intermediate activation is lane-aligned; the padding is exact
    (relu(0 + 0) = 0 and the corresponding zero rows of w2t contribute
    nothing).  The output axis is NOT padded -- the kernel writes exactly
    n_output columns.
    """
    n_hidden, n_feature = w1.shape
    n_output = w2.shape[0]
    h_pad = _round_up(n_hidden, 128)

    w1t = jnp.zeros((n_feature, h_pad), compute_dtype)
    w1t = w1t.at[:, :n_hidden].set(w1.T.astype(compute_dtype))
    b1p = jnp.zeros((1, h_pad), jnp.float32).at[:, :n_hidden].set(b1)
    w2t = jnp.zeros((h_pad, n_output), compute_dtype)
    w2t = w2t.at[:n_hidden, :].set(w2.T.astype(compute_dtype))
    b2p = b2.astype(jnp.float32).reshape(1, n_output)

    return {
        "w1t": w1t, "b1": b1p, "w2t": w2t, "b2": b2p,
        "n_feature": n_feature, "n_output": n_output,
    }


def net_forward(x, params, *, bm=1024):
    """x: (B, n_feature) -> (B, n_output) in x.dtype.

    bm is the requested batch tile (rows per grid step).  The effective tile
    is a multiple of 8 and is capped so that B > 8 always yields >= 2
    "parallel" grid steps (both v7x TensorCores get work).  VMEM per step is
    ~bm*(n_feature + n_output)*4 B double-buffered plus a few KB of resident
    weights -- comfortably inside the 16 MiB (v5e) / 32 MiB (v6e, v7x)
    scoped-VMEM defaults for bm up to several thousand rows.
    """
    B, n_feature = x.shape
    assert n_feature == params["n_feature"]
    n_output = params["n_output"]
    h_pad = params["w1t"].shape[1]

    if B > 8:
        bm_eff = max(8, min(bm, _round_up(pl.cdiv(B, 2), 8)))
    else:
        bm_eff = 8
    grid = (pl.cdiv(B, bm_eff),)  # ragged last tile handled by Pallas masking

    # TODO(synk): n_feature (16) is well below the 128-lane vreg width; if the
    # network shape is negotiable, pack several independent MLPs (or features)
    # onto the lane axis.  Not pursued: the kernel is HBM-bound, not MXU-bound.
    return pl.pallas_call(
        mlp_kernel,
        out_shape=jax.ShapeDtypeStruct((B, n_output), x.dtype),
        grid_spec=pltpu.PrefetchScalarGridSpec(
            num_scalar_prefetch=0,
            grid=grid,
            in_specs=[
                pl.BlockSpec((bm_eff, n_feature), lambda i: (i, 0)),
                # Constant-indexed weights/biases stay VMEM-resident across
                # batch tiles (no per-step re-DMA).
                pl.BlockSpec((n_feature, h_pad), lambda i: (0, 0)),
                pl.BlockSpec((1, h_pad), lambda i: (0, 0)),
                pl.BlockSpec((h_pad, n_output), lambda i: (0, 0)),
                pl.BlockSpec((1, n_output), lambda i: (0, 0)),
            ],
            out_specs=pl.BlockSpec((bm_eff, n_output), lambda i: (i, 0)),
        ),
        compiler_params=pltpu.CompilerParams(
            dimension_semantics=("parallel",)),
    )(x, params["w1t"], params["b1"], params["w2t"], params["b2"])


def init_params(key, n_feature, n_hidden, n_output):
    # Deterministic init mimicking torch.nn.Linear default:
    # U(-1/sqrt(fan_in), 1/sqrt(fan_in)) for both weight and bias.
    k1, k2, k3, k4 = jax.random.split(key, 4)
    bound1 = 1.0 / jnp.sqrt(n_feature)
    bound2 = 1.0 / jnp.sqrt(n_hidden)
    w1 = jax.random.uniform(k1, (n_hidden, n_feature), jnp.float32, -bound1, bound1)
    b1 = jax.random.uniform(k2, (n_hidden,), jnp.float32, -bound1, bound1)
    w2 = jax.random.uniform(k3, (n_output, n_hidden), jnp.float32, -bound2, bound2)
    b2 = jax.random.uniform(k4, (n_output,), jnp.float32, -bound2, bound2)
    return w1, b1, w2, b2


if __name__ == "__main__":
    n_feature, n_hidden, n_output = 16, 32, 8

    key = jax.random.PRNGKey(0)
    kx1, kx2, kp = jax.random.split(key, 3)
    w1, b1, w2, b2 = init_params(kp, n_feature, n_hidden, n_output)

    def ref_fn(x):
        # Reference in plain JAX (same semantics as the PyTorch module).
        return jnp.maximum(x @ w1.T + b1, 0.0) @ w2.T + b2

    # Tight f32 check: batch=16 -> 2 parallel tiles of 8 rows each.
    batch = 16
    x = jax.random.normal(kx1, (batch, n_feature), jnp.float32)
    params_f32 = prepare_params(w1, b1, w2, b2, compute_dtype=jnp.float32)
    out = jax.block_until_ready(net_forward(x, params_f32))
    assert out.shape == (batch, n_output)
    assert jnp.allclose(out, ref_fn(x), atol=1e-5, rtol=1e-5)

    # Default bf16-operand path (f32 accumulation) + ragged last tile (B=13,
    # not a multiple of the 8-row tile) to exercise Pallas boundary masking.
    params_bf16 = prepare_params(w1, b1, w2, b2)  # bf16 operands by default
    x13 = jax.random.normal(kx2, (13, n_feature), jnp.float32)
    out13 = jax.block_until_ready(net_forward(x13, params_bf16))
    assert out13.shape == (13, n_output)
    assert jnp.allclose(out13, ref_fn(x13), atol=1e-1, rtol=1e-1)

    print("KERNEL_OK")
</pallas_src>

<mosaic_0001>
module attributes {stable_mosaic.version = 11 : i64} {
  func.func @mlp_kernel(%arg0: i32, %arg1: memref<8x16xf32, #tpu.memory_space<vmem>>, %arg2: memref<16x128xf32, #tpu.memory_space<vmem>>, %arg3: memref<1x128xf32, #tpu.memory_space<vmem>>, %arg4: memref<128x8xf32, #tpu.memory_space<vmem>>, %arg5: memref<1x8xf32, #tpu.memory_space<vmem>>, %arg6: memref<8x8xf32, #tpu.memory_space<vmem>>) attributes {dimension_semantics = [#tpu.dimension_semantics<parallel>], iteration_bounds = array<i64: 2>, scalar_prefetch = 0 : i64, scratch_operands = 0 : i64, tpu.core_type = #tpu.core_type<tc>, window_params = [{transform_indices = @transform_0, window_bounds = array<i64: 8, 16>}, {pipeline_mode = #tpu.pipeline_mode<synchronous>, transform_indices = @transform_1, window_bounds = array<i64: 16, 128>}, {pipeline_mode = #tpu.pipeline_mode<synchronous>, transform_indices = @transform_2, window_bounds = array<i64: 1, 128>}, {pipeline_mode = #tpu.pipeline_mode<synchronous>, transform_indices = @transform_3, window_bounds = array<i64: 128, 8>}, {pipeline_mode = #tpu.pipeline_mode<synchronous>, transform_indices = @transform_4, window_bounds = array<i64: 1, 8>}, {transform_indices = @transform_5, window_bounds = array<i64: 8, 8>}]} {
    %c0 = arith.constant 0 : index
    %c0_0 = arith.constant 0 : index
    %0 = vector.load %arg1[%c0, %c0_0] : memref<8x16xf32, #tpu.memory_space<vmem>>, vector<8x16xf32>
    %c0_1 = arith.constant 0 : index
    %c0_2 = arith.constant 0 : index
    %1 = vector.load %arg2[%c0_1, %c0_2] : memref<16x128xf32, #tpu.memory_space<vmem>>, vector<16x128xf32>
    %cst = arith.constant dense<0.000000e+00> : vector<8x128xf32>
    %2 = tpu.matmul %0, %1, %cst {dimension_numbers = #tpu.dot_dimension_numbers<[1], [0], [0], [1], [0, 0, 1, 1], [], []>} : vector<8x16xf32>, vector<16x128xf32>, vector<8x128xf32> -> vector<8x128xf32>
    %c0_3 = arith.constant 0 : index
    %c0_4 = arith.constant 0 : index
    %3 = vector.load %arg3[%c0_3, %c0_4] : memref<1x128xf32, #tpu.memory_space<vmem>>, vector<1x128xf32>
    %4 = vector.broadcast %3 : vector<1x128xf32> to vector<8x128xf32>
    %5 = arith.addf %2, %4 : vector<8x128xf32>
    %cst_5 = arith.constant 0.000000e+00 : f32
    %6 = vector.broadcast %cst_5 : f32 to vector<8x128xf32>
    %7 = arith.maximumf %5, %6 : vector<8x128xf32>
    %c0_6 = arith.constant 0 : index
    %c0_7 = arith.constant 0 : index
    %8 = vector.load %arg4[%c0_6, %c0_7] : memref<128x8xf32, #tpu.memory_space<vmem>>, vector<128x8xf32>
    %cst_8 = arith.constant dense<0.000000e+00> : vector<8x8xf32>
    %9 = tpu.matmul %7, %8, %cst_8 {dimension_numbers = #tpu.dot_dimension_numbers<[1], [0], [0], [1], [0, 0, 1, 1], [], []>} : vector<8x128xf32>, vector<128x8xf32>, vector<8x8xf32> -> vector<8x8xf32>
    %c0_9 = arith.constant 0 : index
    %c0_10 = arith.constant 0 : index
    %10 = vector.load %arg5[%c0_9, %c0_10] : memref<1x8xf32, #tpu.memory_space<vmem>>, vector<1x8xf32>
    %11 = vector.broadcast %10 : vector<1x8xf32> to vector<8x8xf32>
    %12 = arith.addf %9, %11 : vector<8x8xf32>
    %c0_11 = arith.constant 0 : index
    %c0_12 = arith.constant 0 : index
    %13 = vector.load %arg6[%c0_11, %c0_12] : memref<8x8xf32, #tpu.memory_space<vmem>>, vector<8x8xf32>
    tpu.vector_store %arg6[%c0_11, %c0_12], %12 {strides = array<i32>} : memref<8x8xf32, #tpu.memory_space<vmem>>, vector<8x8xf32>,
    return
  }
  func.func @transform_0(%arg0: i32) -> (i32, i32) {
    %c0_i32 = arith.constant 0 : i32
    %c0_i32_0 = arith.constant 0 : i32
    return %arg0, %c0_i32 : i32, i32
  }
  func.func @transform_1(%arg0: i32) -> (i32, i32) {
    %c0_i32 = arith.constant 0 : i32
    %c0_i32_0 = arith.constant 0 : i32
    %c0_i32_1 = arith.constant 0 : i32
    return %c0_i32, %c0_i32_0 : i32, i32
  }
  func.func @transform_2(%arg0: i32) -> (i32, i32) {
    %c0_i32 = arith.constant 0 : i32
    %c0_i32_0 = arith.constant 0 : i32
    %c0_i32_1 = arith.constant 0 : i32
    return %c0_i32, %c0_i32_0 : i32, i32
  }
  func.func @transform_3(%arg0: i32) -> (i32, i32) {
    %c0_i32 = arith.constant 0 : i32
    %c0_i32_0 = arith.constant 0 : i32
    %c0_i32_1 = arith.constant 0 : i32
    return %c0_i32, %c0_i32_0 : i32, i32
  }
  func.func @transform_4(%arg0: i32) -> (i32, i32) {
    %c0_i32 = arith.constant 0 : i32
    %c0_i32_0 = arith.constant 0 : i32
    %c0_i32_1 = arith.constant 0 : i32
    return %c0_i32, %c0_i32_0 : i32, i32
  }
  func.func @transform_5(%arg0: i32) -> (i32, i32) {
    %c0_i32 = arith.constant 0 : i32
    %c0_i32_0 = arith.constant 0 : i32
    return %arg0, %c0_i32 : i32, i32
  }
}

</mosaic_0001>

<bundles_post_ra>
// kernel: tpu_custom_call.1
= control target key start
LH: loop header
LB: loop body
LE: loop exit
PB: predicated region body
PF: predicated region fallthrough
CT: control target
= control target key end

     0   :  { %s606_s18 = smov 0   ;;  %s690_s0 = inlined_call_operand.vmem [shape: f32[16,16], index: 0, kind: input, shape index: {}]   ;;  %s691_s1 = inlined_call_operand.vmem [shape: f32[16,128], index: 1, kind: input, shape index: {}]   ;;  %s692_s2 = inlined_call_operand.vmem [shape: f32[1,128], index: 2, kind: input, shape index: {}]   ;;  %s693_s3 = inlined_call_operand.vmem [shape: f32[128,8], index: 3, kind: input, shape index: {}]   ;;  %s694_s4 = inlined_call_operand.vmem [shape: f32[1,8], index: 4, kind: input, shape index: {}]   ;;  %s695_s5 = inlined_call_operand.vmem [shape: f32[16,8], index: 5, kind: output, shape index: {}]  }
   0x1 LB: > { %s453_s19 = sadd.s32 4294967295, %s571_s18   ;;  %p457_p0 = scmp.ge.s32.totalorder %s571_s18, 1  ;;  %s571_s18 = sphi %s606_s18, %s15_s18  }
   0x2   : > { %p186_p1 = scmp.lt.s32.totalorder %s571_s18, 3 }
   0x4   : > { %p187_p2 = pnand %p457_p0, %p186_p1 }
   0x5   : > { %v221_v0 = vld [vmem:[%s691_s1] sm:$0xff] (!%p187_p2)  ;;  %v222_v1 = vld [vmem:[%s691_s1 + $0x8] sm:$0xff] (!%p187_p2)  ;;  %p212_p3 = scmp.lt.s32.totalorder (!%p187_p2), %s453_s19, 1  ;;  %v573_v2 = vmov (!%p187_p2), 0.0|0.0   ;;  %vm574_vm0 = vmmov (!%p187_p2), 0   ;;  %v575_v4 = vmov (!%p187_p2), 0.0  }
   0x6   : > { %190 = sbr.rel (%p187_p2) target bundleno = 448 (0x1c0), region = 40  ;;  %527 = vmatprep.subr.bf16.mxu0 (!%p187_p2), %v573_v2  ;;  %v528_v3 = vpack.c.bf16 (!%p187_p2), %v222_v1, %v221_v0  ;;  %489 = vmatprep.mubr.msk.f32.mxu0 (!%p187_p2), %vm574_vm0, %v575_v4  ;;  %v305_v5 = vld [vmem:[%s693_s3] sm:$0xff] (!%p187_p2)  ;;  %v306_v6 = vld [vmem:[%s693_s3 + $0x8] sm:$0xff] (!%p187_p2)  ;;  %v307_v7 = vld [vmem:[%s693_s3 + $0x10] sm:$0xff] (!%p187_p2)  ;;  %vm230_vm1 = vcmask (!%p187_p2), 130048   ;;  %vm398_vm2 = vcmask (!%p187_p2), 64512  }
   0x7   : > { %530 = vmatprep.subr.bf16.mxu1 (!%p187_p2), %v573_v2  ;;  %v531_v8 = vpack.c.bf16 (!%p187_p2), %v306_v6, %v305_v5  ;;  %v308_v9 = vld [vmem:[%s693_s3 + $0x18] sm:$0xff] (!%p187_p2)  ;;  %524 = vmatprep.mubr.msk.f32.mxu1 (!%p187_p2), %vm574_vm0, %v575_v4  ;;  %v309_v11 = vld [vmem:[%s693_s3 + $0x20] sm:$0xff] (!%p187_p2)  ;;  %v310_v12 = vld [vmem:[%s693_s3 + $0x28] sm:$0xff] (!%p187_p2) }
   0x8   : > { %529 = vmatpush3.bf16.msra.mxu0 (!%p187_p2), %v528_v3  ;;  %v534_v10 = vpack.c.bf16 (!%p187_p2), %v308_v9, %v307_v7  ;;  %v537_v14 = vpack.c.bf16 (!%p187_p2), %v310_v12, %v309_v11  ;;  %v311_v15 = vld [vmem:[%s693_s3 + $0x30] sm:$0xff] (!%p187_p2)  ;;  %v312_v16 = vld [vmem:[%s693_s3 + $0x38] sm:$0xff] (!%p187_p2)  ;;  %v313_v18 = vld [vmem:[%s693_s3 + $0x40] sm:$0xff] (!%p187_p2) }
   0x9   : > { %532 = vmatpush3.bf16.msra.mxu1 (!%p187_p2), %v531_v8  ;;  %v540_v17 = vpack.c.bf16 (!%p187_p2), %v312_v16, %v311_v15  ;;  %v314_v19 = vld [vmem:[%s693_s3 + $0x48] sm:$0xff] (!%p187_p2)  ;;  %v315_v21 = vld [vmem:[%s693_s3 + $0x50] sm:$0xff] (!%p187_p2)  ;;  %v316_v22 = vld [vmem:[%s693_s3 + $0x58] sm:$0xff] (!%p187_p2) }
   0xa   : > { %533 = vmatprep.subr.bf16.mxu1 (!%p187_p2), %v573_v2  ;;  %v543_v20 = vpack.c.bf16 (!%p187_p2), %v314_v19, %v313_v18  ;;  %v546_v23 = vpack.c.bf16 (!%p187_p2), %v316_v22, %v315_v21  ;;  %v317_v24 = vld [vmem:[%s693_s3 + $0x60] sm:$0xff] (!%p187_p2)  ;;  %v318_v25 = vld [vmem:[%s693_s3 + $0x68] sm:$0xff] (!%p187_p2)  ;;  %v319_v27 = vld [vmem:[%s693_s3 + $0x70] sm:$0xff] (!%p187_p2) }
   0xb   : > { %v549_v26 = vpack.c.bf16 (!%p187_p2), %v318_v25, %v317_v24  ;;  %v320_v28 = vld [vmem:[%s693_s3 + $0x78] sm:$0xff] (!%p187_p2)  ;;  %v460_v30 = vld [vmem:[%s692_s2] ss:$0 sm:$0xff] (!%p187_p2) }
   0xc   : > { %v552_v29 = vpack.c.bf16 (!%p187_p2), %v320_v28, %v319_v27  ;;  %v462_v35 = vld [vmem:[%s694_s4] ss:$0 sm:$0xff] (!%p187_p2) }
   0xd   : > { %s697_s19 = smov (!%p212_p3, %s453_s19), 1  ;;  %535 = vmatpush3.bf16.msra.mxu1 %v534_v10 }
   0xe   : > { %s458_s7 = sshll.u32 %s697_s19, 3  ;;  %536 = vmatprep.subr.bf16.mxu1 %v573_v2 }
   0xf   : > { %s215_s10 = scalar_lea.vmem %s690_s0, %s458_s7  ;;  %s219_s21 = scalar_lea.vmem %s695_s5, %s458_s7 }
  0x10   : > { %v220_v13 = vld [vmem:[%s215_s10] sm:$0xff] }
  0x11   : > { %490 = vmatmul.mubr.msk.f32.vlgmr.msra.gmra.mrb[0].mxu0 %vm230_vm1, %v220_v13  ;;  %538 = vmatpush3.bf16.msra.mxu1 %v537_v14 }
  0x12   : > { %539 = vmatprep.subr.bf16.mxu1 %v573_v2 }
  0x15   : > { %541 = vmatpush3.bf16.msra.mxu1 %v540_v17 }
  0x16   : > { %542 = vmatprep.subr.bf16.mxu1 %v573_v2 }
  0x19   : > { %544 = vmatpush3.bf16.msra.mxu1 %v543_v20 }
  0x1a   : > { %545 = vmatprep.subr.bf16.mxu1 %v573_v2 }
  0x1d   : > { %547 = vmatpush3.bf16.msra.mxu1 %v546_v23 }
  0x1e   : > { %548 = vmatprep.subr.bf16.mxu1 %v573_v2 }
  0x21   : > { %550 = vmatpush3.bf16.msra.mxu1 %v549_v26 }
  0x22   : > { %551 = vmatprep.subr.bf16.mxu1 %v573_v2 }
  0x25   : > { %553 = vmatpush3.bf16.msra.mxu1 %v552_v29 }
  0xe4   : > { %v300_v31 = vpop.f32.mrb[0].mxu0 }
  0xe5   : > { %v301_v32 = vadd.f32 %v460_v30, %v300_v31  ;;  %v491_v33 = vpop.f32.mrb[1].mxu0 }
  0xe7   : > { %v304_v34 = vmax.f32 %v301_v32, 0.0 }
  0xe9   : > { %525 = vmatmul.mubr.f32.vlgmr.msra.gmra.mrb[0].mxu1 %v304_v34 }
 0x1bc   : > { %v394_v36 = vpop.f32.mrb[0].mxu1 }
 0x1bd   : > { %v395_v37 = vadd.f32 %v462_v35, %v394_v36  ;;  %v526_v38 = vpop.f32.mrb[1].mxu1 }
 0x1bf   : > { %399 = vst.msk [vmem:[%s219_s21] sm:$0xff] %vm398_vm2, %v395_v37 }
 0x1c0 PF: > { %s15_s18 = sadd.s32 1, %s571_s18  }
 0x1c1   : > { %p12_p4 = scmp.ge.s32.totalorder %s15_s18, 4  }
 0x1c3   :  { %14 = sbr.rel (!%p12_p4) target bundleno = 1 (0x1), region = 70 }

</bundles_post_ra>
